<compile_context>
chip_gen: v6e
topology: v6e:2x2x1
jax: 0.10.0
libtpu: 0.0.40
codegen_flags: <defaults>
</compile_context>

<pallas_src>
import functools

import jax
import jax.numpy as jnp
from jax.experimental import pallas as pl
from jax.experimental.pallas import tpu as pltpu

_EPS = 1e-7
_LANES = 128


def _recip(x):
    # approx reciprocal -> EUP slot, frees VALU bundles (loss-tolerant precision).
    return pl.reciprocal(x, approx=True)


def _atan(x):
    """f32-accurate arctangent (Cephes atanf scheme) from VPU/EUP-supported ops.

    Mosaic does not reliably lower math.atan, so use range reduction + odd poly.
    """
    sign = jnp.where(x < 0.0, -1.0, 1.0).astype(jnp.float32)
    ax = jnp.abs(x)
    tan3pi8 = jnp.float32(2.414213562373095)   # tan(3*pi/8)
    tanpi8 = jnp.float32(0.4142135623730951)   # tan(pi/8)

    big = ax > tan3pi8
    mid = jnp.logical_and(ax > tanpi8, jnp.logical_not(big))

    base = jnp.where(big, jnp.float32(jnp.pi / 2),
                     jnp.where(mid, jnp.float32(jnp.pi / 4), jnp.float32(0.0)))
    z = jnp.where(big, -_recip(jnp.maximum(ax, 1e-30)),
                  jnp.where(mid, (ax - 1.0) * _recip(ax + 1.0), ax))
    z2 = z * z
    p = (((8.05374449538e-2 * z2 - 1.38776856032e-1) * z2
          + 1.99777106478e-1) * z2 - 3.33329491539e-1)
    return sign * (base + p * z2 * z + z)


def _ciou_loss_kernel(box_ref, out_ref, acc_ref, *, n_valid, tile_m):
    # box_ref: (8, tile_m, 128) f32 planes [px1,py1,px2,py2,gx1,gy1,gx2,gy2]
    # out_ref: (1, 1) f32 mean loss; acc_ref: (1, 1) f32 running sum scratch.
    i = pl.program_id(0)

    @pl.when(i == 0)
    def _():
        acc_ref[...] = jnp.zeros_like(acc_ref)

    px1, py1, px2, py2 = box_ref[0], box_ref[1], box_ref[2], box_ref[3]
    gx1, gy1, gx2, gy2 = box_ref[4], box_ref[5], box_ref[6], box_ref[7]

    pw = px2 - px1
    ph = py2 - py1
    gw = gx2 - gx1
    gh = gy2 - gy1

    # intersection / union -> IoU
    iw = jnp.maximum(jnp.minimum(px2, gx2) - jnp.maximum(px1, gx1), 0.0)
    ih = jnp.maximum(jnp.minimum(py2, gy2) - jnp.maximum(py1, gy1), 0.0)
    inter = iw * ih
    union = pw * ph + gw * gh - inter + _EPS
    iou = inter * _recip(union)

    # smallest enclosing box diagonal^2
    cw = jnp.maximum(px2, gx2) - jnp.minimum(px1, gx1)
    ch = jnp.maximum(py2, gy2) - jnp.minimum(py1, gy1)
    c2 = cw * cw + ch * ch + _EPS

    # squared center distance
    rho2 = ((gx1 + gx2 - px1 - px2) ** 2 + (gy1 + gy2 - py1 - py2) ** 2) * 0.25

    # aspect-ratio consistency term
    dv = _atan(gw * _recip(gh + _EPS)) - _atan(pw * _recip(ph + _EPS))
    v = jnp.float32(4.0 / (jnp.pi ** 2)) * dv * dv
    # NOTE: standard CIoU detaches alpha (no_grad); forward value is identical.
    alpha = v * _recip(1.0 - iou + v + _EPS)

    loss = 1.0 - (iou - rho2 * _recip(c2) - alpha * v)     # (tile_m, 128)

    # Mask padded boxes so the mean is taken over the true N only.
    r = jax.lax.broadcasted_iota(jnp.int32, (tile_m, _LANES), 0)
    l = jax.lax.broadcasted_iota(jnp.int32, (tile_m, _LANES), 1)
    idx = (i * tile_m + r) * _LANES + l
    loss = jnp.where(idx < n_valid, loss, 0.0)

    acc_ref[...] += jnp.sum(loss, axis=(0, 1), keepdims=True)

    @pl.when(i == pl.num_programs(0) - 1)
    def _():
        out_ref[...] = acc_ref[...] * jnp.float32(1.0 / n_valid)


def complete_iou_loss(outputs, gt, *, max_tile_m=512):
    """outputs, gt: (N, 4) boxes in (x1, y1, x2, y2). Returns scalar mean CIoU loss."""
    outputs = outputs.astype(jnp.float32)
    gt = gt.astype(jnp.float32)
    n = outputs.shape[0]

    # Tile sizing: (8, tile_m, 128) f32 = tile_m * 4 KiB per buffer; tile_m=512
    # -> 2 MiB/buffer, 4 MiB double-buffered -> fits v5e/v6e/v7x scoped VMEM.
    m_needed = -(-n // _LANES)                              # ceil(N / 128)
    tile_m = max(8, min(max_tile_m, ((m_needed + 7) // 8) * 8))
    m = ((m_needed + tile_m - 1) // tile_m) * tile_m
    n_pad = m * _LANES

    # Pack pred+gt into one planar (8, M, 128) array: one DMA stream, all
    # coordinate planes lane/sublane-dense.
    # TODO(synk): for very large N, keep boxes planar upstream to avoid this
    #             extra transpose pass right before a memory-bound kernel.
    boxes = jnp.concatenate([outputs, gt], axis=1)          # (N, 8)
    boxes = jnp.pad(boxes, ((0, n_pad - n), (0, 0)))
    planes = boxes.T.reshape(8, m, _LANES)                  # (8, M, 128)

    kernel = functools.partial(_ciou_loss_kernel, n_valid=n, tile_m=tile_m)
    out = pl.pallas_call(
        kernel,
        out_shape=jax.ShapeDtypeStruct((1, 1), jnp.float32),
        grid_spec=pltpu.PrefetchScalarGridSpec(
            num_scalar_prefetch=0,
            grid=(m // tile_m,),
            in_specs=[pl.BlockSpec((8, tile_m, _LANES), lambda i: (0, i, 0))],
            out_specs=pl.BlockSpec((1, 1), lambda i: (0, 0)),
            scratch_shapes=[pltpu.VMEM((1, 1), jnp.float32)],
        ),
        compiler_params=pltpu.CompilerParams(
            dimension_semantics=("arbitrary",)),
    )(planes)
    return out[0, 0]


def _ciou_loss_ref(p, g):
    """Pure-JAX reference (exact divides / arctan) for sanity checking."""
    px1, py1, px2, py2 = p[:, 0], p[:, 1], p[:, 2], p[:, 3]
    gx1, gy1, gx2, gy2 = g[:, 0], g[:, 1], g[:, 2], g[:, 3]
    pw, ph = px2 - px1, py2 - py1
    gw, gh = gx2 - gx1, gy2 - gy1
    iw = jnp.maximum(jnp.minimum(px2, gx2) - jnp.maximum(px1, gx1), 0.0)
    ih = jnp.maximum(jnp.minimum(py2, gy2) - jnp.maximum(py1, gy1), 0.0)
    inter = iw * ih
    union = pw * ph + gw * gh - inter + _EPS
    iou = inter / union
    cw = jnp.maximum(px2, gx2) - jnp.minimum(px1, gx1)
    ch = jnp.maximum(py2, gy2) - jnp.minimum(py1, gy1)
    c2 = cw * cw + ch * ch + _EPS
    rho2 = ((gx1 + gx2 - px1 - px2) ** 2 + (gy1 + gy2 - py1 - py2) ** 2) * 0.25
    v = (4.0 / (jnp.pi ** 2)) * (jnp.arctan(gw / (gh + _EPS))
                                 - jnp.arctan(pw / (ph + _EPS))) ** 2
    alpha = v / (1.0 - iou + v + _EPS)
    return jnp.mean(1.0 - (iou - rho2 / c2 - alpha * v))


if __name__ == "__main__":
    key = jax.random.PRNGKey(0)
    k1, k2, k3, k4 = jax.random.split(key, 4)
    n = 200   # deliberately not a multiple of 128 to exercise the mask path

    # deterministic synthetic valid boxes in (x1, y1, x2, y2)
    xy_p = jax.random.uniform(k1, (n, 2), minval=0.0, maxval=0.5)
    wh_p = jax.random.uniform(k2, (n, 2), minval=0.1, maxval=0.5)
    outputs = jnp.concatenate([xy_p, xy_p + wh_p], axis=1).astype(jnp.float32)

    xy_g = jax.random.uniform(k3, (n, 2), minval=0.0, maxval=0.5)
    wh_g = jax.random.uniform(k4, (n, 2), minval=0.1, maxval=0.5)
    gt = jnp.concatenate([xy_g, xy_g + wh_g], axis=1).astype(jnp.float32)

    loss = complete_iou_loss(outputs, gt)
    jax.block_until_ready(loss)

    ref = _ciou_loss_ref(outputs, gt)
    assert loss.shape == () and bool(jnp.isfinite(loss))
    assert abs(float(loss) - float(ref)) < 1e-2 * max(1.0, abs(float(ref)))
    print("KERNEL_OK")
</pallas_src>

<mosaic_0001>
module attributes {stable_mosaic.version = 11 : i64} {
  func.func @_ciou_loss_kernel(%arg0: i32, %arg1: memref<8x8x128xf32, #tpu.memory_space<vmem>>, %arg2: memref<1x1xf32, #tpu.memory_space<vmem>>, %arg3: memref<1x1xf32, #tpu.memory_space<vmem>>) attributes {dimension_semantics = [#tpu.dimension_semantics<arbitrary>], iteration_bounds = array<i64: 1>, scalar_prefetch = 0 : i64, scratch_operands = 1 : i64, tpu.core_type = #tpu.core_type<tc>, window_params = [{transform_indices = @transform_0, window_bounds = array<i64: 8, 8, 128>}, {pipeline_mode = #tpu.pipeline_mode<synchronous>, transform_indices = @transform_1, window_bounds = array<i64: 1, 1>}]} {
    %c0_i32 = arith.constant 0 : i32
    %0 = arith.cmpi eq, %arg0, %c0_i32 : i32
    %1 = arith.extui %0 : i1 to i32
    %c0_i32_0 = arith.constant 0 : i32
    %2 = arith.cmpi ne, %1, %c0_i32_0 : i32
    scf.if %2 {
      %cst_69 = arith.constant 0.000000e+00 : f32
      %205 = vector.broadcast %cst_69 : f32 to vector<1x1xf32>
      %c0_70 = arith.constant 0 : index
      %c0_71 = arith.constant 0 : index
      %206 = vector.load %arg3[%c0_70, %c0_71] : memref<1x1xf32, #tpu.memory_space<vmem>>, vector<1x1xf32>
      tpu.vector_store %arg3[%c0_70, %c0_71], %205 {strides = array<i32>} : memref<1x1xf32, #tpu.memory_space<vmem>>, vector<1x1xf32>,
    } else {
    }
    %c0 = arith.constant 0 : index
    %c0_1 = arith.constant 0 : index
    %c0_2 = arith.constant 0 : index
    %3 = vector.load %arg1[%c0, %c0_1, %c0_2] : memref<8x8x128xf32, #tpu.memory_space<vmem>>, vector<1x8x128xf32>
    %4 = vector.shape_cast %3 : vector<1x8x128xf32> to vector<8x128xf32>
    %c1 = arith.constant 1 : index
    %c0_3 = arith.constant 0 : index
    %c0_4 = arith.constant 0 : index
    %5 = vector.load %arg1[%c1, %c0_3, %c0_4] : memref<8x8x128xf32, #tpu.memory_space<vmem>>, vector<1x8x128xf32>
    %6 = vector.shape_cast %5 : vector<1x8x128xf32> to vector<8x128xf32>
    %c2 = arith.constant 2 : index
    %c0_5 = arith.constant 0 : index
    %c0_6 = arith.constant 0 : index
    %7 = vector.load %arg1[%c2, %c0_5, %c0_6] : memref<8x8x128xf32, #tpu.memory_space<vmem>>, vector<1x8x128xf32>
    %8 = vector.shape_cast %7 : vector<1x8x128xf32> to vector<8x128xf32>
    %c3 = arith.constant 3 : index
    %c0_7 = arith.constant 0 : index
    %c0_8 = arith.constant 0 : index
    %9 = vector.load %arg1[%c3, %c0_7, %c0_8] : memref<8x8x128xf32, #tpu.memory_space<vmem>>, vector<1x8x128xf32>
    %10 = vector.shape_cast %9 : vector<1x8x128xf32> to vector<8x128xf32>
    %c4 = arith.constant 4 : index
    %c0_9 = arith.constant 0 : index
    %c0_10 = arith.constant 0 : index
    %11 = vector.load %arg1[%c4, %c0_9, %c0_10] : memref<8x8x128xf32, #tpu.memory_space<vmem>>, vector<1x8x128xf32>
    %12 = vector.shape_cast %11 : vector<1x8x128xf32> to vector<8x128xf32>
    %c5 = arith.constant 5 : index
    %c0_11 = arith.constant 0 : index
    %c0_12 = arith.constant 0 : index
    %13 = vector.load %arg1[%c5, %c0_11, %c0_12] : memref<8x8x128xf32, #tpu.memory_space<vmem>>, vector<1x8x128xf32>
    %14 = vector.shape_cast %13 : vector<1x8x128xf32> to vector<8x128xf32>
    %c6 = arith.constant 6 : index
    %c0_13 = arith.constant 0 : index
    %c0_14 = arith.constant 0 : index
    %15 = vector.load %arg1[%c6, %c0_13, %c0_14] : memref<8x8x128xf32, #tpu.memory_space<vmem>>, vector<1x8x128xf32>
    %16 = vector.shape_cast %15 : vector<1x8x128xf32> to vector<8x128xf32>
    %c7 = arith.constant 7 : index
    %c0_15 = arith.constant 0 : index
    %c0_16 = arith.constant 0 : index
    %17 = vector.load %arg1[%c7, %c0_15, %c0_16] : memref<8x8x128xf32, #tpu.memory_space<vmem>>, vector<1x8x128xf32>
    %18 = vector.shape_cast %17 : vector<1x8x128xf32> to vector<8x128xf32>
    %19 = arith.subf %8, %4 : vector<8x128xf32>
    %20 = arith.subf %10, %6 : vector<8x128xf32>
    %21 = arith.subf %16, %12 : vector<8x128xf32>
    %22 = arith.subf %18, %14 : vector<8x128xf32>
    %23 = arith.minimumf %8, %16 : vector<8x128xf32>
    %24 = arith.maximumf %4, %12 : vector<8x128xf32>
    %25 = arith.subf %23, %24 : vector<8x128xf32>
    %cst = arith.constant 0.000000e+00 : f32
    %26 = vector.broadcast %cst : f32 to vector<8x128xf32>
    %27 = arith.maximumf %25, %26 : vector<8x128xf32>
    %28 = arith.minimumf %10, %18 : vector<8x128xf32>
    %29 = arith.maximumf %6, %14 : vector<8x128xf32>
    %30 = arith.subf %28, %29 : vector<8x128xf32>
    %cst_17 = arith.constant 0.000000e+00 : f32
    %31 = vector.broadcast %cst_17 : f32 to vector<8x128xf32>
    %32 = arith.maximumf %30, %31 : vector<8x128xf32>
    %33 = arith.mulf %27, %32 : vector<8x128xf32>
    %34 = arith.mulf %19, %20 : vector<8x128xf32>
    %35 = arith.mulf %21, %22 : vector<8x128xf32>
    %36 = arith.addf %34, %35 : vector<8x128xf32>
    %37 = arith.subf %36, %33 : vector<8x128xf32>
    %cst_18 = arith.constant 1.000000e-07 : f32
    %38 = vector.broadcast %cst_18 : f32 to vector<8x128xf32>
    %39 = arith.addf %37, %38 : vector<8x128xf32>
    %40 = tpu.reciprocal %39 {approx = true} : vector<8x128xf32> -> vector<8x128xf32>
    %41 = arith.mulf %33, %40 : vector<8x128xf32>
    %42 = arith.maximumf %8, %16 : vector<8x128xf32>
    %43 = arith.minimumf %4, %12 : vector<8x128xf32>
    %44 = arith.subf %42, %43 : vector<8x128xf32>
    %45 = arith.maximumf %10, %18 : vector<8x128xf32>
    %46 = arith.minimumf %6, %14 : vector<8x128xf32>
    %47 = arith.subf %45, %46 : vector<8x128xf32>
    %48 = arith.mulf %44, %44 : vector<8x128xf32>
    %49 = arith.mulf %47, %47 : vector<8x128xf32>
    %50 = arith.addf %48, %49 : vector<8x128xf32>
    %cst_19 = arith.constant 1.000000e-07 : f32
    %51 = vector.broadcast %cst_19 : f32 to vector<8x128xf32>
    %52 = arith.addf %50, %51 : vector<8x128xf32>
    %53 = arith.addf %12, %16 : vector<8x128xf32>
    %54 = arith.subf %53, %4 : vector<8x128xf32>
    %55 = arith.subf %54, %8 : vector<8x128xf32>
    %56 = arith.mulf %55, %55 : vector<8x128xf32>
    %57 = arith.addf %14, %18 : vector<8x128xf32>
    %58 = arith.subf %57, %6 : vector<8x128xf32>
    %59 = arith.subf %58, %10 : vector<8x128xf32>
    %60 = arith.mulf %59, %59 : vector<8x128xf32>
    %61 = arith.addf %56, %60 : vector<8x128xf32>
    %cst_20 = arith.constant 2.500000e-01 : f32
    %62 = vector.broadcast %cst_20 : f32 to vector<8x128xf32>
    %63 = arith.mulf %61, %62 : vector<8x128xf32>
    %cst_21 = arith.constant 1.000000e-07 : f32
    %64 = vector.broadcast %cst_21 : f32 to vector<8x128xf32>
    %65 = arith.addf %22, %64 : vector<8x128xf32>
    %66 = tpu.reciprocal %65 {approx = true} : vector<8x128xf32> -> vector<8x128xf32>
    %67 = arith.mulf %21, %66 : vector<8x128xf32>
    %cst_22 = arith.constant 0.000000e+00 : f32
    %68 = vector.broadcast %cst_22 : f32 to vector<8x128xf32>
    %69 = arith.cmpf olt, %67, %68 : vector<8x128xf32>
    %cst_23 = arith.constant -1.000000e+00 : f32
    %cst_24 = arith.constant 1.000000e+00 : f32
    %70 = vector.broadcast %cst_23 : f32 to vector<8x128xf32>
    %71 = vector.broadcast %cst_24 : f32 to vector<8x128xf32>
    %72 = arith.select %69, %70, %71 : vector<8x128xi1>, vector<8x128xf32>
    %73 = math.absf %67 : vector<8x128xf32>
    %cst_25 = arith.constant 2.41421366 : f32
    %74 = vector.broadcast %cst_25 : f32 to vector<8x128xf32>
    %75 = arith.cmpf ogt, %73, %74 : vector<8x128xf32>
    %cst_26 = arith.constant 0.414213568 : f32
    %76 = vector.broadcast %cst_26 : f32 to vector<8x128xf32>
    %77 = arith.cmpf ogt, %73, %76 : vector<8x128xf32>
    %cst_27 = arith.constant dense<true> : vector<8x128xi1>
    %78 = arith.xori %75, %cst_27 : vector<8x128xi1>
    %79 = arith.andi %77, %78 : vector<8x128xi1>
    %cst_28 = arith.constant 0.785398185 : f32
    %cst_29 = arith.constant 0.000000e+00 : f32
    %80 = vector.broadcast %cst_28 : f32 to vector<8x128xf32>
    %81 = vector.broadcast %cst_29 : f32 to vector<8x128xf32>
    %82 = arith.select %79, %80, %81 : vector<8x128xi1>, vector<8x128xf32>
    %cst_30 = arith.constant 1.57079637 : f32
    %83 = vector.broadcast %cst_30 : f32 to vector<8x128xf32>
    %84 = arith.select %75, %83, %82 : vector<8x128xi1>, vector<8x128xf32>
    %cst_31 = arith.constant 1.000000e-30 : f32
    %85 = vector.broadcast %cst_31 : f32 to vector<8x128xf32>
    %86 = arith.maximumf %73, %85 : vector<8x128xf32>
    %87 = tpu.reciprocal %86 {approx = true} : vector<8x128xf32> -> vector<8x128xf32>
    %cst_32 = arith.constant 0.000000e+00 : f32
    %88 = vector.broadcast %cst_32 : f32 to vector<8x128xf32>
    %89 = arith.subf %88, %87 : vector<8x128xf32>
    %cst_33 = arith.constant 1.000000e+00 : f32
    %90 = vector.broadcast %cst_33 : f32 to vector<8x128xf32>
    %91 = arith.subf %73, %90 : vector<8x128xf32>
    %cst_34 = arith.constant 1.000000e+00 : f32
    %92 = vector.broadcast %cst_34 : f32 to vector<8x128xf32>
    %93 = arith.addf %73, %92 : vector<8x128xf32>
    %94 = tpu.reciprocal %93 {approx = true} : vector<8x128xf32> -> vector<8x128xf32>
    %95 = arith.mulf %91, %94 : vector<8x128xf32>
    %96 = arith.select %79, %95, %73 : vector<8x128xi1>, vector<8x128xf32>
    %97 = arith.select %75, %89, %96 : vector<8x128xi1>, vector<8x128xf32>
    %98 = arith.mulf %97, %97 : vector<8x128xf32>
    %cst_35 = arith.constant 0.0805374458 : f32
    %99 = vector.broadcast %cst_35 : f32 to vector<8x128xf32>
    %100 = arith.mulf %99, %98 : vector<8x128xf32>
    %cst_36 = arith.constant 0.138776854 : f32
    %101 = vector.broadcast %cst_36 : f32 to vector<8x128xf32>
    %102 = arith.subf %100, %101 : vector<8x128xf32>
    %103 = arith.mulf %102, %98 : vector<8x128xf32>
    %cst_37 = arith.constant 0.199777111 : f32
    %104 = vector.broadcast %cst_37 : f32 to vector<8x128xf32>
    %105 = arith.addf %103, %104 : vector<8x128xf32>
    %106 = arith.mulf %105, %98 : vector<8x128xf32>
    %cst_38 = arith.constant 0.333329499 : f32
    %107 = vector.broadcast %cst_38 : f32 to vector<8x128xf32>
    %108 = arith.subf %106, %107 : vector<8x128xf32>
    %109 = arith.mulf %108, %98 : vector<8x128xf32>
    %110 = arith.mulf %109, %97 : vector<8x128xf32>
    %111 = arith.addf %84, %110 : vector<8x128xf32>
    %112 = arith.addf %111, %97 : vector<8x128xf32>
    %113 = arith.mulf %72, %112 : vector<8x128xf32>
    %cst_39 = arith.constant 1.000000e-07 : f32
    %114 = vector.broadcast %cst_39 : f32 to vector<8x128xf32>
    %115 = arith.addf %20, %114 : vector<8x128xf32>
    %116 = tpu.reciprocal %115 {approx = true} : vector<8x128xf32> -> vector<8x128xf32>
    %117 = arith.mulf %19, %116 : vector<8x128xf32>
    %cst_40 = arith.constant 0.000000e+00 : f32
    %118 = vector.broadcast %cst_40 : f32 to vector<8x128xf32>
    %119 = arith.cmpf olt, %117, %118 : vector<8x128xf32>
    %cst_41 = arith.constant -1.000000e+00 : f32
    %cst_42 = arith.constant 1.000000e+00 : f32
    %120 = vector.broadcast %cst_41 : f32 to vector<8x128xf32>
    %121 = vector.broadcast %cst_42 : f32 to vector<8x128xf32>
    %122 = arith.select %119, %120, %121 : vector<8x128xi1>, vector<8x128xf32>
    %123 = math.absf %117 : vector<8x128xf32>
    %cst_43 = arith.constant 2.41421366 : f32
    %124 = vector.broadcast %cst_43 : f32 to vector<8x128xf32>
    %125 = arith.cmpf ogt, %123, %124 : vector<8x128xf32>
    %cst_44 = arith.constant 0.414213568 : f32
    %126 = vector.broadcast %cst_44 : f32 to vector<8x128xf32>
    %127 = arith.cmpf ogt, %123, %126 : vector<8x128xf32>
    %cst_45 = arith.constant dense<true> : vector<8x128xi1>
    %128 = arith.xori %125, %cst_45 : vector<8x128xi1>
    %129 = arith.andi %127, %128 : vector<8x128xi1>
    %cst_46 = arith.constant 0.785398185 : f32
    %cst_47 = arith.constant 0.000000e+00 : f32
    %130 = vector.broadcast %cst_46 : f32 to vector<8x128xf32>
    %131 = vector.broadcast %cst_47 : f32 to vector<8x128xf32>
    %132 = arith.select %129, %130, %131 : vector<8x128xi1>, vector<8x128xf32>
    %cst_48 = arith.constant 1.57079637 : f32
    %133 = vector.broadcast %cst_48 : f32 to vector<8x128xf32>
    %134 = arith.select %125, %133, %132 : vector<8x128xi1>, vector<8x128xf32>
    %cst_49 = arith.constant 1.000000e-30 : f32
    %135 = vector.broadcast %cst_49 : f32 to vector<8x128xf32>
    %136 = arith.maximumf %123, %135 : vector<8x128xf32>
    %137 = tpu.reciprocal %136 {approx = true} : vector<8x128xf32> -> vector<8x128xf32>
    %cst_50 = arith.constant 0.000000e+00 : f32
    %138 = vector.broadcast %cst_50 : f32 to vector<8x128xf32>
    %139 = arith.subf %138, %137 : vector<8x128xf32>
    %cst_51 = arith.constant 1.000000e+00 : f32
    %140 = vector.broadcast %cst_51 : f32 to vector<8x128xf32>
    %141 = arith.subf %123, %140 : vector<8x128xf32>
    %cst_52 = arith.constant 1.000000e+00 : f32
    %142 = vector.broadcast %cst_52 : f32 to vector<8x128xf32>
    %143 = arith.addf %123, %142 : vector<8x128xf32>
    %144 = tpu.reciprocal %143 {approx = true} : vector<8x128xf32> -> vector<8x128xf32>
    %145 = arith.mulf %141, %144 : vector<8x128xf32>
    %146 = arith.select %129, %145, %123 : vector<8x128xi1>, vector<8x128xf32>
    %147 = arith.select %125, %139, %146 : vector<8x128xi1>, vector<8x128xf32>
    %148 = arith.mulf %147, %147 : vector<8x128xf32>
    %cst_53 = arith.constant 0.0805374458 : f32
    %149 = vector.broadcast %cst_53 : f32 to vector<8x128xf32>
    %150 = arith.mulf %149, %148 : vector<8x128xf32>
    %cst_54 = arith.constant 0.138776854 : f32
    %151 = vector.broadcast %cst_54 : f32 to vector<8x128xf32>
    %152 = arith.subf %150, %151 : vector<8x128xf32>
    %153 = arith.mulf %152, %148 : vector<8x128xf32>
    %cst_55 = arith.constant 0.199777111 : f32
    %154 = vector.broadcast %cst_55 : f32 to vector<8x128xf32>
    %155 = arith.addf %153, %154 : vector<8x128xf32>
    %156 = arith.mulf %155, %148 : vector<8x128xf32>
    %cst_56 = arith.constant 0.333329499 : f32
    %157 = vector.broadcast %cst_56 : f32 to vector<8x128xf32>
    %158 = arith.subf %156, %157 : vector<8x128xf32>
    %159 = arith.mulf %158, %148 : vector<8x128xf32>
    %160 = arith.mulf %159, %147 : vector<8x128xf32>
    %161 = arith.addf %134, %160 : vector<8x128xf32>
    %162 = arith.addf %161, %147 : vector<8x128xf32>
    %163 = arith.mulf %122, %162 : vector<8x128xf32>
    %164 = arith.subf %113, %163 : vector<8x128xf32>
    %cst_57 = arith.constant 0.405284733 : f32
    %165 = vector.broadcast %cst_57 : f32 to vector<8x128xf32>
    %166 = arith.mulf %165, %164 : vector<8x128xf32>
    %167 = arith.mulf %166, %164 : vector<8x128xf32>
    %cst_58 = arith.constant 1.000000e+00 : f32
    %168 = vector.broadcast %cst_58 : f32 to vector<8x128xf32>
    %169 = arith.subf %168, %41 : vector<8x128xf32>
    %170 = arith.addf %169, %167 : vector<8x128xf32>
    %cst_59 = arith.constant 1.000000e-07 : f32
    %171 = vector.broadcast %cst_59 : f32 to vector<8x128xf32>
    %172 = arith.addf %170, %171 : vector<8x128xf32>
    %173 = tpu.reciprocal %172 {approx = true} : vector<8x128xf32> -> vector<8x128xf32>
    %174 = arith.mulf %167, %173 : vector<8x128xf32>
    %175 = tpu.reciprocal %52 {approx = true} : vector<8x128xf32> -> vector<8x128xf32>
    %176 = arith.mulf %63, %175 : vector<8x128xf32>
    %177 = arith.subf %41, %176 : vector<8x128xf32>
    %178 = arith.mulf %174, %167 : vector<8x128xf32>
    %179 = arith.subf %177, %178 : vector<8x128xf32>
    %cst_60 = arith.constant 1.000000e+00 : f32
    %180 = vector.broadcast %cst_60 : f32 to vector<8x128xf32>
    %181 = arith.subf %180, %179 : vector<8x128xf32>
    %182 = tpu.iota {dimensions = array<i32: 0>} : vector<8x128xi32>
    %183 = tpu.iota {dimensions = array<i32: 1>} : vector<8x128xi32>
    %c8_i32 = arith.constant 8 : i32
    %184 = arith.muli %arg0, %c8_i32 : i32
    %185 = vector.broadcast %184 : i32 to vector<8x128xi32>
    %186 = arith.addi %185, %182 : vector<8x128xi32>
    %c128_i32 = arith.constant 128 : i32
    %187 = vector.broadcast %c128_i32 : i32 to vector<8x128xi32>
    %188 = arith.muli %186, %187 : vector<8x128xi32>
    %189 = arith.addi %188, %183 : vector<8x128xi32>
    %c200_i32 = arith.constant 200 : i32
    %190 = vector.broadcast %c200_i32 : i32 to vector<8x128xi32>
    %191 = arith.cmpi slt, %189, %190 : vector<8x128xi32>
    %cst_61 = arith.constant 0.000000e+00 : f32
    %192 = vector.broadcast %cst_61 : f32 to vector<8x128xf32>
    %193 = arith.select %191, %181, %192 : vector<8x128xi1>, vector<8x128xf32>
    %c0_62 = arith.constant 0 : index
    %c0_63 = arith.constant 0 : index
    %194 = vector.load %arg3[%c0_62, %c0_63] : memref<1x1xf32, #tpu.memory_space<vmem>>, vector<1x1xf32>
    %195 = vector.shape_cast %193 : vector<8x128xf32> to vector<1x8x128xf32>
    %cst_64 = arith.constant dense<0.000000e+00> : vector<1xf32>
    %196 = vector.multi_reduction <add>, %195, %cst_64 [1, 2] : vector<1x8x128xf32> to vector<1xf32>
    %197 = vector.shape_cast %196 : vector<1xf32> to vector<1x1x1xf32>
    %198 = vector.extract %197[0, 0, 0] : f32 from vector<1x1x1xf32>
    %199 = vector.broadcast %198 : f32 to vector<1x1xf32>
    %200 = arith.addf %194, %199 : vector<1x1xf32>
    %c0_65 = arith.constant 0 : index
    %c0_66 = arith.constant 0 : index
    %201 = vector.load %arg3[%c0_65, %c0_66] : memref<1x1xf32, #tpu.memory_space<vmem>>, vector<1x1xf32>
    tpu.vector_store %arg3[%c0_65, %c0_66], %200 {strides = array<i32>} : memref<1x1xf32, #tpu.memory_space<vmem>>, vector<1x1xf32>,
    %c0_i32_67 = arith.constant 0 : i32
    %202 = arith.cmpi eq, %arg0, %c0_i32_67 : i32
    %203 = arith.extui %202 : i1 to i32
    %c0_i32_68 = arith.constant 0 : i32
    %204 = arith.cmpi ne, %203, %c0_i32_68 : i32
    scf.if %204 {
      %c0_69 = arith.constant 0 : index
      %c0_70 = arith.constant 0 : index
      %205 = vector.load %arg3[%c0_69, %c0_70] : memref<1x1xf32, #tpu.memory_space<vmem>>, vector<1x1xf32>
      %cst_71 = arith.constant 5.000000e-03 : f32
      %206 = vector.broadcast %cst_71 : f32 to vector<1x1xf32>
      %207 = arith.mulf %205, %206 : vector<1x1xf32>
      %c0_72 = arith.constant 0 : index
      %c0_73 = arith.constant 0 : index
      %208 = vector.load %arg2[%c0_72, %c0_73] : memref<1x1xf32, #tpu.memory_space<vmem>>, vector<1x1xf32>
      tpu.vector_store %arg2[%c0_72, %c0_73], %207 {strides = array<i32>} : memref<1x1xf32, #tpu.memory_space<vmem>>, vector<1x1xf32>,
    } else {
    }
    return
  }
  func.func @transform_0(%arg0: i32) -> (i32, i32, i32) {
    %c0_i32 = arith.constant 0 : i32
    %c0_i32_0 = arith.constant 0 : i32
    %c0_i32_1 = arith.constant 0 : i32
    return %c0_i32, %arg0, %c0_i32_0 : i32, i32, i32
  }
  func.func @transform_1(%arg0: i32) -> (i32, i32) {
    %c0_i32 = arith.constant 0 : i32
    %c0_i32_0 = arith.constant 0 : i32
    %c0_i32_1 = arith.constant 0 : i32
    return %c0_i32, %c0_i32_0 : i32, i32
  }
}

</mosaic_0001>

<bundles_post_ra>
// kernel: tpu_custom_call.1
= control target key start
LH: loop header
LB: loop body
LE: loop exit
PB: predicated region body
PF: predicated region fallthrough
CT: control target
= control target key end

     0   :  { %6 = vsyncpa [#allocation4], 0  ;;  %s368_s0 = inlined_call_operand.hbm [shape: f32[8,8,128], index: 0, kind: input, shape index: {}]   ;;  %s369_s1 = inlined_call_operand.hbm [shape: f32[1,1], index: 1, kind: output, shape index: {}]  }
   0x1   :  { %7 = vsyncpa [#allocation5], 0  ;;  %s287_s6 = smov [#allocation3]  }
   0x2   :  { %s13_s7 = sshll.u32 %s287_s6, 4  ;;  %s14_s7 = int_to_ptr.vmem [resolvable:$true] %s13_s7 }
   0x3   :  { %s251_s8 = scalar_lea.vmem %s14_s7, 1024  ;;  %p256_p1 = scmp.lt.s32.totalorder %s14_s7, %s14_s7 }
   0x4   :  { %p252_p0 = scmp.ne.s32.totalorder %s14_s7, %s251_s8  ;;  %p257_p2 = scmp.lt.s32.totalorder %s251_s8, %s251_s8 }
   0x6   :  { %p258_p3 = por %p257_p2, %p256_p1 }
   0x8   :  { %p259_p4 = pnand %p258_p3, %p252_p0 }
   0xa   :  { %262 = shalt.err (!%p259_p4)
}
   0xb   :  { %s288_s9 = smov 128   ;;  %s289_s10 = smov 8  }
   0xc   :  { %19 = dma.hbm_to_vmem [thread:$0]  %s368_s0, 1024, %s14_s7, [#allocation4], %s288_s9, %s288_s9, %s289_s10  }
   0xd   :  { %283 = dma.done.wait [#allocation4], 1024  }
   0xe   :  { %284 = vsyncadd [#allocation4], 4294966272  ;;  %v29_v0 = vld [vmem:[#allocation3] sm:$0xff]  ;;  %v39_v2 = vld [vmem:[#allocation3 + $0x28] sm:$0xff]  ;;  %vm290_vm2 = vmmov 1   ;;  %vm27_vm12 = vcmask 0  }
   0xf   :  { %v37_v1 = vld [vmem:[#allocation3 + $0x20] sm:$0xff]  ;;  %v31_v3 = vld [vmem:[#allocation3 + $0x8] sm:$0xff]  ;;  %v35_v4 = vld [vmem:[#allocation3 + $0x18] sm:$0xff]  ;;  %s293_s13 = smov [#allocation6]  }
  0x10   :  { %v43_v5 = vld [vmem:[#allocation3 + $0x38] sm:$0xff]  ;;  %v65_v6 = vmin.f32 %v29_v0, %v37_v1  ;;  %v33_v7 = vld [vmem:[#allocation3 + $0x10] sm:$0xff]  ;;  %v68_v12 = vmin.f32 %v31_v3, %v39_v2  ;;  %v45_v13 = vsub.f32 %v35_v4, %v31_v3  ;;  %v49_v46 = vmax.f32 %v29_v0, %v37_v1  ;;  %s201_s14 = sshll.u32 %s293_s13, 4  ;;  %s202_s14 = int_to_ptr.vmem [resolvable:$true] %s201_s14 }
  0x11   :  { %v41_v8 = vld [vmem:[#allocation3 + $0x30] sm:$0xff]  ;;  %v47_v9 = vsub.f32 %v43_v5, %v39_v2  ;;  %v67_v11 = vmax.f32 %v35_v4, %v43_v5  ;;  %v78_v17 = vadd.f32 %v43_v5, %v39_v2  ;;  %v44_v33 = vsub.f32 %v33_v7, %v29_v0  ;;  %s263_s15 = scalar_lea.vmem %s202_s14, 16  ;;  %s267_s16 = scalar_lea.vmem %s202_s14, 32 }
  0x12   :  { %v64_v10 = vmax.f32 %v33_v7, %v41_v8  ;;  %v74_v14 = vadd.f32 %v41_v8, %v37_v1  ;;  %v117_v24 = vadd.f32 1e-07, %v45_v13  ;;  %v46_v31 = vsub.f32 %v41_v8, %v37_v1  ;;  %p264_p5 = scmp.ne.s32.totalorder %s202_s14, %s263_s15  ;;  %p268_p6 = scmp.lt.s32.totalorder %s202_s14, %s202_s14 }
  0x13   :  { %v69_v16 = vsub.f32 %v67_v11, %v68_v12  ;;  %v84_v18 = vadd.f32 1e-07, %v47_v9  ;;  %v79_v22 = vsub.f32 %v78_v17, %v31_v3  ;;  %v48_v47 = vmin.f32 %v33_v7, %v41_v8  ;;  %p269_p7 = scmp.lt.s32.totalorder %s267_s16, %s263_s15 }
  0x14   :  { %v66_v15 = vsub.f32 %v64_v10, %v65_v6  ;;  %v75_v19 = vsub.f32 %v74_v14, %v29_v0  ;;  %v52_v48 = vmin.f32 %v35_v4, %v43_v5  ;;  %v53_v49 = vmax.f32 %v31_v3, %v39_v2 }
  0x15   :  { %v71_v21 = vmul.f32 %v69_v16, %v69_v16  ;;  %225 = vrcp.f32 %v84_v18  ;;  %v80_v26 = vsub.f32 %v79_v22, %v35_v4  ;;  %v50_v50 = vsub.f32 %v48_v47, %v49_v46  ;;  %p270_p8 = por %p269_p7, %p268_p6 }
  0x16   :  { %v70_v20 = vmul.f32 %v66_v15, %v66_v15  ;;  %v76_v23 = vsub.f32 %v75_v19, %v33_v7  ;;  %227 = vrcp.f32 %v117_v24  ;;  %v54_v51 = vsub.f32 %v52_v48, %v53_v49 }
  0x17   :  { %v81_v29 = vmul.f32 %v80_v26, %v80_v26  ;;  %v51_v54 = vmax.f32 %v50_v50, 0.0  ;;  %v57_v56 = vmul.f32 %v45_v13, %v44_v33  ;;  %v58_v57 = vmul.f32 %v47_v9, %v46_v31  ;;  %p271_p9 = pnand %p270_p8, %p264_p5 }
  0x18   :  { %v72_v25 = vadd.f32 %v71_v21, %v70_v20  ;;  %v77_v27 = vmul.f32 %v76_v23, %v76_v23  ;;  %v55_v55 = vmax.f32 %v54_v51, 0.0  ;;  %v291_v22 = vmov 0.0  }
  0x19   :  { %v59_v1 = vadd.f32 %v58_v57, %v57_v56  ;;  %28 = vst.msk [vmem:[#allocation2] sm:$0x1] %vm27_vm12, %v291_v22 }
  0x1a   :  { %v73_v28 = vadd.f32 1e-07, %v72_v25  ;;  %v82_v30 = vadd.f32 %v81_v29, %v77_v27  ;;  %v56_v0 = vmul.f32 %v55_v55, %v51_v54  ;;  %v164_v54 = vlaneseq }
  0x1c   :  { %229 = vrcp.f32 %v73_v28  ;;  %v83_v36 = vmul.f32 0.25, %v82_v30  ;;  %v60_v9 = vsub.f32 %v59_v1, %v56_v0  ;;  %v165_v55 = vshrl.u32 %v164_v54, 7 }
  0x1e   :  { %v61_v15 = vadd.f32 1e-07, %v60_v9  ;;  %v171_v56 = vmul.u32 128, %v165_v55 }
  0x22   :  { %v226_v32 = vpop.eup %225 }
  0x23   :  { %v307_v34 = vmul.f32 %v226_v32, %v46_v31  ;;  %v228_v35 = vpop.eup %227 }
  0x24   :  { %v312_v38 = vmul.f32 %v228_v35, %v44_v33 }
  0x25   :  { %v310_v37 = vand.u32 2147483647, %v307_v34  ;;  %vm87_vm9 = vcmp.lt.f32.partialorder %v307_v34, 0.0 }
  0x26   :  { %v317_v42 = vand.u32 2147483647, %v312_v38  ;;  %vm120_vm10 = vcmp.lt.f32.partialorder %v312_v38, 0.0  ;;  %v167_v38 = vand.u32 127, %v164_v54 }
  0x27   :  { %v96_v39 = vmax.f32 %v310_v37, 1e-30  ;;  %v100_v41 = vadd.f32 1.0, %v310_v37  ;;  %vm90_vm0 = vcmp.gt.f32.partialorder %v310_v37, 2.4142137  ;;  %v210_v52 = vadd.f32 -1.0, %v310_v37 }
  0x28   :  { %v129_v44 = vmax.f32 %v317_v42, 1e-30  ;;  %v133_v45 = vadd.f32 1.0, %v317_v42  ;;  %vm91_vm1 = vcmp.gt.f32.partialorder %v310_v37, 0.41421357  ;;  %vm92_vm3 = vmxor %vm90_vm0, %vm290_vm2  ;;  %v213_v62 = vadd.f32 -1.0, %v317_v42 }
  0x29   :  { %v230_v40 = vpop.eup %229  ;;  %231 = vrcp.f32 %v96_v39  ;;  %vm123_vm4 = vcmp.gt.f32.partialorder %v317_v42, 2.4142137  ;;  %vm329_vm5 = vmand %vm91_vm1, %vm92_vm3  ;;  %vm124_vm6 = vcmp.gt.f32.partialorder %v317_v42, 0.41421357 }
  0x2a   :  { %v319_v43 = vmul.f32 %v230_v40, %v83_v36  ;;  %233 = vrcp.f32 %v100_v41  ;;  %vm125_vm7 = vmxor %vm123_vm4, %vm290_vm2  ;;  %v94_v23 = vsel %vm329_vm5, 0.7853982, %v291_v22  ;;  %v292_v40 = vmov 1.0  }
  0x2b   :  { %235 = vrcp.f32 %v129_v44  ;;  %vm342_vm8 = vmand %vm124_vm6, %vm125_vm7  ;;  %v95_v28 = vsel %vm90_vm0, 1.5707964, %v94_v23  ;;  %v88_v41 = vsel %vm87_vm9, -1.0, %v292_v40 }
  0x2c   :  { %237 = vrcp.f32 %v133_v45  ;;  %v127_v30 = vsel %vm342_vm8, 0.7853982, %v291_v22  ;;  %v121_v45 = vsel %vm120_vm10, -1.0, %v292_v40 }
  0x2d   :  { %239 = vrcp.f32 %v61_v15  ;;  %v128_v35 = vsel %vm123_vm4, 1.5707964, %v127_v30 }
  0x36   :  { %v232_v53 = vpop.eup %231 }
  0x37   :  { %v234_v58 = vpop.eup %233  ;;  %v98_v60 = vsub.f32 0.0, %v232_v53 }
  0x38   :  { %v102_v61 = vmul.f32 %v234_v58, %v210_v52  ;;  %v236_v63 = vpop.eup %235 }
  0x39   :  { %v238_v3 = vpop.eup %237  ;;  %v131_v6 = vsub.f32 0.0, %v236_v63 }
  0x3a   :  { %v103_v2 = vsel %vm329_vm5, %v102_v61, %v310_v37  ;;  %v135_v8 = vmul.f32 %v238_v3, %v213_v62  ;;  %v240_v44 = vpop.eup %239 }
  0x3b   :  { %v104_v4 = vsel %vm90_vm0, %v98_v60, %v103_v2  ;;  %v63_v48 = vmul.f32 %v240_v44, %v56_v0  ;;  %v172_v60 = vadd.s32 %v171_v56, %v167_v38 }
  0x3c   :  { %v105_v7 = vmul.f32 %v104_v4, %v104_v4  ;;  %v136_v11 = vsel %vm342_vm8, %v135_v8, %v317_v42  ;;  %v175_v8 = vld [vmem:[#allocation2] sm:$0x1] }
  0x3d   :  { %v137_v12 = vsel %vm123_vm4, %v131_v6, %v136_v11  ;;  %v153_v51 = vsub.f32 1.0, %v63_v48  ;;  %v160_v59 = vsub.f32 %v63_v48, %v319_v43  ;;  %vm173_vm11 = vcmp.lt.s32.totalorder %v172_v60, 200 }
  0x3e   :  { %v106_v10 = vmul.f32 0.080537446, %v105_v7  ;;  %v138_v14 = vmul.f32 %v137_v12, %v137_v12 }
  0x40   :  { %v211_v13 = vadd.f32 -0.13877685, %v106_v10  ;;  %v139_v17 = vmul.f32 0.080537446, %v138_v14 }
  0x42   :  { %v108_v16 = vmul.f32 %v211_v13, %v105_v7  ;;  %v214_v19 = vadd.f32 -0.13877685, %v139_v17 }
  0x44   :  { %v109_v18 = vadd.f32 0.19977711, %v108_v16  ;;  %v141_v21 = vmul.f32 %v214_v19, %v138_v14 }
  0x46   :  { %v110_v20 = vmul.f32 %v109_v18, %v105_v7  ;;  %v142_v25 = vadd.f32 0.19977711, %v141_v21 }
  0x48   :  { %v212_v24 = vadd.f32 -0.3333295, %v110_v20  ;;  %v143_v27 = vmul.f32 %v142_v25, %v138_v14 }
  0x4a   :  { %v112_v26 = vmul.f32 %v212_v24, %v105_v7  ;;  %v215_v31 = vadd.f32 -0.3333295, %v143_v27 }
  0x4c   :  { %v113_v29 = vmul.f32 %v112_v26, %v104_v4  ;;  %v145_v33 = vmul.f32 %v215_v31, %v138_v14 }
  0x4e   :  { %v114_v32 = vadd.f32 %v113_v29, %v95_v28  ;;  %v146_v39 = vmul.f32 %v145_v33, %v137_v12 }
  0x50   :  { %v115_v36 = vadd.f32 %v114_v32, %v104_v4  ;;  %v147_v37 = vadd.f32 %v146_v39, %v128_v35 }
  0x52   :  { %v116_v46 = vmul.f32 %v115_v36, %v88_v41  ;;  %v148_v47 = vadd.f32 %v147_v37, %v137_v12 }
  0x54   :  { %v149_v49 = vmul.f32 %v148_v47, %v121_v45 }
  0x56   :  { %v150_v50 = vsub.f32 %v116_v46, %v149_v49 }
  0x58   :  { %v151_v34 = vmul.f32 0.40528473, %v150_v50 }
  0x5a   :  { %v152_v52 = vmul.f32 %v151_v34, %v150_v50 }
  0x5c   :  { %v154_v53 = vadd.f32 %v153_v51, %v152_v52 }
  0x5e   :  { %v155_v42 = vadd.f32 1e-07, %v154_v53 }
  0x60   :  { %241 = vrcp.f32 %v155_v42 }
  0x6d   :  { %v242_v57 = vpop.eup %241 }
  0x6e   :  { %v157_v58 = vmul.f32 %v242_v57, %v152_v52 }
  0x70   :  { %v161_v61 = vmul.f32 %v157_v58, %v152_v52 }
  0x72   :  { %v162_v62 = vsub.f32 %v160_v59, %v161_v61 }
  0x74   :  { %v163_v63 = vsub.f32 1.0, %v162_v62 }
  0x76   :  { %v174_v0 = vsel %vm173_vm11, %v163_v63, 0.0 }
  0x77   :  { %176 = vadd.xlane.f32.xlu0 %v174_v0 }
 0x100   :  { %v177_v1 = vpop.xlane.xlu0 %176 }
 0x101   :  { %v178_v2 = vrot.slane %v177_v1, 4 }
 0x103   :  { %v179_v3 = vadd.f32 %v178_v2, %v177_v1 }
 0x105   :  { %v180_v4 = vrot.slane %v179_v3, 2 }
 0x107   :  { %v181_v5 = vadd.f32 %v180_v4, %v179_v3 }
 0x109   :  { %v182_v6 = vrot.slane %v181_v5, 1 }
 0x10b   :  { %v183_v7 = vadd.f32 %v182_v6, %v181_v5 }
 0x10d   :  { %216 = vpush %v183_v7 }
 0x13e   :  { %s217_s0 = spop %216 }
 0x13f   :  { %v185_v43 = vstv %s217_s0 }
 0x140   :  { %v186_v9 = vadd.f32 %v185_v43, %v175_v8 }
 0x142   :  { %188 = vst.msk [vmem:[#allocation2] sm:$0x1] %vm27_vm12, %v186_v9 }
 0x149   :  { %v192_v10 = vld [vmem:[#allocation2] sm:$0x1] }
 0x14a   :  { %v193_v11 = vmul.f32 0.005, %v192_v10 }
 0x14c   :  { %194 = vst.msk [vmem:[#allocation6] sm:$0x1] %vm27_vm12, %v193_v11 }
 0x14d   :  { %274 = shalt.err (!%p271_p9)
}
 0x14e   :  { %204 = dma.vmem_to_hbm [thread:$0]  %s202_s14, 16, %s369_s1, [#allocation5]  }
 0x14f   :  { %285 = dma.done.wait [#allocation5], 16  }
 0x150   :  { %286 = vsyncadd [#allocation5], 4294967280 }
 0x151   :  { %208 = vsyncpa [#allocation4], 1 }
 0x152   :  { %209 = vsyncpa [#allocation5], 1 }

</bundles_post_ra>
